<compile_context>
chip_gen: v5e
topology: v5e:2x2
jax: 0.10.0
libtpu: 0.0.40
codegen_flags: <defaults>
</compile_context>

<pallas_src>
import jax
import jax.numpy as jnp
from jax.experimental import pallas as pl
from jax.experimental.pallas import tpu as pltpu


def _mlp_kernel(x_ref, w1_ref, b1_ref, w2_ref, b2_ref, o_ref):
    # Layer 1 on the MXU: (TN, H) @ (H, H//2), f32 accumulation.
    h = jnp.dot(x_ref[...], w1_ref[...], preferred_element_type=jnp.float32)
    h = jnp.maximum(h + b1_ref[...], 0.0)  # bias + ReLU on the VPU
    # Dropout(p=0.5) is identity in eval/inference mode.
    # TODO(synk): training-mode dropout (PRNG mask + 1/(1-p) scaling) not implemented.
    # Layer 2: (TN, H//2) * (1, H//2) row, then cross-lane sum. A (H//2, 1)
    # MXU matmul would use 1 of 128/256 output columns; the VPU/XLU slots have
    # slack while the first matmul owns the MXU, so this is effectively free.
    y = jnp.sum(h * w2_ref[...], axis=-1, keepdims=True) + b2_ref[0, 0]
    o_ref[...] = y.astype(o_ref.dtype)


def value_predictor(x, w1, b1, w2_row, b2, *, block_rows=512,
                    compute_dtype=jnp.bfloat16):
    """Fused MLP forward.

    x:      (N, H)      input rows (row-major, like PyTorch Linear input)
    w1:     (H, H//2)   first Linear weight, pre-transposed to (in, out)
    b1:     (1, H//2)   first Linear bias as a row (broadcast over batch)
    w2_row: (1, H//2)   second Linear weight as a row (PyTorch (out=1, in))
    b2:     (1, 1)      second Linear bias (scalar, kept in SMEM)
    """
    n, h = x.shape
    h2 = w1.shape[1]

    if compute_dtype is not None:
        x = x.astype(compute_dtype)
        w1 = w1.astype(compute_dtype)

    # Batch tile: large enough to amortize ~0.35 us/step overhead, small enough
    # that the 2x double-buffered x tile fits the smallest scoped-VMEM default.
    itemsize = jnp.dtype(x.dtype).itemsize
    vmem_budget = 6 * 1024 * 1024                               # for the two x-tile buffers
    max_rows = max(8, ((vmem_budget // max(1, 2 * h * itemsize)) // 8) * 8)
    tn = min(block_rows, n, max_rows)
    if tn < n:
        tn = max(8, (tn // 8) * 8)   # block second-minor dim must be a multiple of 8

    grid = (pl.cdiv(n, tn),)

    # Note: output stays (TN, 1) (lane-sparse store) — it is tiny relative to
    # the streamed x reads; lane-dense output slab deliberately not done here.
    return pl.pallas_call(
        _mlp_kernel,
        out_shape=jax.ShapeDtypeStruct((n, 1), jnp.float32),
        grid_spec=pl.GridSpec(
            grid=grid,
            in_specs=[
                pl.BlockSpec((tn, h), lambda i: (i, 0)),             # x: streamed per tile
                pl.BlockSpec((h, h2), lambda i: (0, 0)),             # w1: VMEM-resident
                pl.BlockSpec((1, h2), lambda i: (0, 0)),             # b1: VMEM-resident row
                pl.BlockSpec((1, h2), lambda i: (0, 0)),             # w2 row: VMEM-resident
                pl.BlockSpec(memory_space=pltpu.MemorySpace.SMEM),   # b2: scalar in SMEM
            ],
            out_specs=pl.BlockSpec((tn, 1), lambda i: (i, 0)),
        ),
        compiler_params=pltpu.CompilerParams(
            dimension_semantics=("parallel",),
        ),
    )(x, w1, b1, w2_row, b2)


def init_params(key, hidden_channels):
    """Deterministic synthetic parameters with PyTorch Linear shapes.

    PyTorch stores Linear weight as (out, in); we construct in that convention
    and transpose/reshape into the layouts the kernel expects.
    """
    h = hidden_channels
    h2 = h // 2
    k1, k2, k3, k4 = jax.random.split(key, 4)
    w1_t = jax.random.uniform(k1, (h2, h), jnp.float32, -1.0, 1.0) / jnp.sqrt(h)
    b1 = jax.random.uniform(k2, (h2,), jnp.float32, -1.0, 1.0) / jnp.sqrt(h)
    w2_t = jax.random.uniform(k3, (1, h2), jnp.float32, -1.0, 1.0) / jnp.sqrt(h2)
    b2 = jax.random.uniform(k4, (1,), jnp.float32, -1.0, 1.0) / jnp.sqrt(h2)
    return (
        w1_t.T,                 # (H, H//2)   -- (in, out) for the kernel
        b1.reshape(1, h2),      # (1, H//2)
        w2_t,                   # (1, H//2)   -- kept as a row for the VPU reduce
        b2.reshape(1, 1),       # (1, 1)
    )


def reference(x, w1, b1, w2_row, b2):
    h = jnp.maximum(x @ w1 + b1, 0.0)
    return h @ w2_row.T + b2


if __name__ == "__main__":
    hidden_channels = 32
    batch = 8

    key = jax.random.PRNGKey(0)
    kx, kp = jax.random.split(key)
    x = jax.random.normal(kx, (batch, hidden_channels), jnp.float32)
    w1, b1, w2, b2 = init_params(kp, hidden_channels)

    ref = reference(x, w1, b1, w2, b2)

    # Full-f32 path: matches the PyTorch eval-mode forward tightly.
    out_f32 = jax.block_until_ready(
        value_predictor(x, w1, b1, w2, b2, compute_dtype=None))
    assert out_f32.shape == (batch, 1), out_f32.shape
    assert jnp.allclose(out_f32, ref, atol=1e-4, rtol=1e-4), (out_f32, ref)

    # bf16-input path (halves HBM bytes streamed for x/w1; f32 accumulation).
    out_bf16 = jax.block_until_ready(
        value_predictor(x, w1, b1, w2, b2, compute_dtype=jnp.bfloat16))
    assert out_bf16.shape == (batch, 1), out_bf16.shape
    assert jnp.allclose(out_bf16, ref, atol=5e-2, rtol=5e-2), (out_bf16, ref)

    print("KERNEL_OK")
</pallas_src>

<mosaic_0001>
module attributes {stable_mosaic.version = 11 : i64} {
  func.func @_mlp_kernel(%arg0: i32, %arg1: memref<8x32xf32, #tpu.memory_space<vmem>>, %arg2: memref<32x16xf32, #tpu.memory_space<vmem>>, %arg3: memref<1x16xf32, #tpu.memory_space<vmem>>, %arg4: memref<1x16xf32, #tpu.memory_space<vmem>>, %arg5: memref<1x1xf32, #tpu.memory_space<smem>>, %arg6: memref<8x1xf32, #tpu.memory_space<vmem>>) attributes {dimension_semantics = [#tpu.dimension_semantics<parallel>], iteration_bounds = array<i64: 1>, scalar_prefetch = 0 : i64, scratch_operands = 0 : i64, tpu.core_type = #tpu.core_type<tc>, window_params = [{transform_indices = @transform_0, window_bounds = array<i64: 8, 32>}, {pipeline_mode = #tpu.pipeline_mode<synchronous>, transform_indices = @transform_1, window_bounds = array<i64: 32, 16>}, {pipeline_mode = #tpu.pipeline_mode<synchronous>, transform_indices = @transform_2, window_bounds = array<i64: 1, 16>}, {pipeline_mode = #tpu.pipeline_mode<synchronous>, transform_indices = @transform_3, window_bounds = array<i64: 1, 16>}, {transform_indices = @transform_4, window_bounds = array<i64: 1, 1>}, {transform_indices = @transform_5, window_bounds = array<i64: 8, 1>}]} {
    %c0 = arith.constant 0 : index
    %c0_0 = arith.constant 0 : index
    %0 = vector.load %arg1[%c0, %c0_0] : memref<8x32xf32, #tpu.memory_space<vmem>>, vector<8x32xf32>
    %c0_1 = arith.constant 0 : index
    %c0_2 = arith.constant 0 : index
    %1 = vector.load %arg2[%c0_1, %c0_2] : memref<32x16xf32, #tpu.memory_space<vmem>>, vector<32x16xf32>
    %cst = arith.constant dense<0.000000e+00> : vector<8x16xf32>
    %2 = tpu.matmul %0, %1, %cst {dimension_numbers = #tpu.dot_dimension_numbers<[1], [0], [0], [1], [0, 0, 1, 1], [], []>} : vector<8x32xf32>, vector<32x16xf32>, vector<8x16xf32> -> vector<8x16xf32>
    %c0_3 = arith.constant 0 : index
    %c0_4 = arith.constant 0 : index
    %3 = vector.load %arg3[%c0_3, %c0_4] : memref<1x16xf32, #tpu.memory_space<vmem>>, vector<1x16xf32>
    %4 = vector.broadcast %3 : vector<1x16xf32> to vector<8x16xf32>
    %5 = arith.addf %2, %4 : vector<8x16xf32>
    %cst_5 = arith.constant 0.000000e+00 : f32
    %6 = vector.broadcast %cst_5 : f32 to vector<8x16xf32>
    %7 = arith.maximumf %5, %6 : vector<8x16xf32>
    %c0_6 = arith.constant 0 : index
    %c0_7 = arith.constant 0 : index
    %8 = vector.load %arg4[%c0_6, %c0_7] : memref<1x16xf32, #tpu.memory_space<vmem>>, vector<1x16xf32>
    %9 = vector.broadcast %8 : vector<1x16xf32> to vector<8x16xf32>
    %10 = arith.mulf %7, %9 : vector<8x16xf32>
    %cst_8 = arith.constant dense<0.000000e+00> : vector<8xf32>
    %11 = vector.multi_reduction <add>, %10, %cst_8 [1] : vector<8x16xf32> to vector<8xf32>
    %12 = vector.shape_cast %11 : vector<8xf32> to vector<8x1xf32>
    %c0_9 = arith.constant 0 : index
    %c0_10 = arith.constant 0 : index
    %13 = memref.load %arg5[%c0_9, %c0_10] : memref<1x1xf32, #tpu.memory_space<smem>>
    %14 = vector.broadcast %13 : f32 to vector<8x1xf32>
    %15 = arith.addf %12, %14 : vector<8x1xf32>
    %c0_11 = arith.constant 0 : index
    %c0_12 = arith.constant 0 : index
    %16 = vector.load %arg6[%c0_11, %c0_12] : memref<8x1xf32, #tpu.memory_space<vmem>>, vector<8x1xf32>
    tpu.vector_store %arg6[%c0_11, %c0_12], %15 {strides = array<i32>} : memref<8x1xf32, #tpu.memory_space<vmem>>, vector<8x1xf32>,
    return
  }
  func.func @transform_0(%arg0: i32) -> (i32, i32) {
    %c0_i32 = arith.constant 0 : i32
    %c0_i32_0 = arith.constant 0 : i32
    return %arg0, %c0_i32 : i32, i32
  }
  func.func @transform_1(%arg0: i32) -> (i32, i32) {
    %c0_i32 = arith.constant 0 : i32
    %c0_i32_0 = arith.constant 0 : i32
    %c0_i32_1 = arith.constant 0 : i32
    return %c0_i32, %c0_i32_0 : i32, i32
  }
  func.func @transform_2(%arg0: i32) -> (i32, i32) {
    %c0_i32 = arith.constant 0 : i32
    %c0_i32_0 = arith.constant 0 : i32
    %c0_i32_1 = arith.constant 0 : i32
    return %c0_i32, %c0_i32_0 : i32, i32
  }
  func.func @transform_3(%arg0: i32) -> (i32, i32) {
    %c0_i32 = arith.constant 0 : i32
    %c0_i32_0 = arith.constant 0 : i32
    %c0_i32_1 = arith.constant 0 : i32
    return %c0_i32, %c0_i32_0 : i32, i32
  }
  func.func @transform_4(%arg0: i32) -> (i32, i32) {
    %c0_i32 = arith.constant 0 : i32
    %c0_i32_0 = arith.constant 0 : i32
    %c0_i32_1 = arith.constant 0 : i32
    return %c0_i32, %c0_i32_0 : i32, i32
  }
  func.func @transform_5(%arg0: i32) -> (i32, i32) {
    %c0_i32 = arith.constant 0 : i32
    %c0_i32_0 = arith.constant 0 : i32
    return %arg0, %c0_i32 : i32, i32
  }
}

</mosaic_0001>

<bundles_post_ra>
// kernel: tpu_custom_call.1
= control target key start
LH: loop header
LB: loop body
LE: loop exit
PB: predicated region body
PF: predicated region fallthrough
CT: control target
= control target key end

     0   :  { %vm30_vm0 = vcmask 261120   ;;  %vm60_vm1 = vcmask 130048   ;;  %vm67_vm2 = vcmask 7168   ;;  %s133_s1 = inlined_call_operand.vmem [shape: f32[32,16], index: 1, kind: input, shape index: {}]   ;;  %s134_s2 = inlined_call_operand.vmem [shape: f32[1,16], index: 2, kind: input, shape index: {}]   ;;  %s135_s0 = inlined_call_operand.vmem [shape: f32[8,32], index: 0, kind: input, shape index: {}]   ;;  %s136_s3 = inlined_call_operand.vmem [shape: f32[1,16], index: 3, kind: input, shape index: {}]   ;;  %s137_s4 = inlined_call_operand.<no memory space> [shape: f32[1,1], index: 4, kind: input, shape index: {}]   ;;  %s138_s5 = inlined_call_operand.vmem [shape: f32[8,1], index: 5, kind: output, shape index: {}]  }
   0x1   :  { %v25_v0 = vld [vmem:[%s133_s1 + $0x18] sm:$0xff]  ;;  %v24_v1 = vld [vmem:[%s133_s1 + $0x10] sm:$0xff]  ;;  %v23_v2 = vld [vmem:[%s133_s1 + $0x8] sm:$0xff]  ;;  %v65_v12 = vstv %s137_s4 }
   0x2   :  { %46 = vmatpush.msra.mxu0 %v25_v0  ;;  %v22_v3 = vld [vmem:[%s133_s1] sm:$0xff] }
   0x3   :  { %v21_v4 = vld [vmem:[%s135_s0] sm:$0xff] }
   0x4   :  { %47 = vmatpush.msra.mxu0 %v24_v1  ;;  %v74_v5 = vld [vmem:[%s134_s2] ss:$0 sm:$0xff] }
   0x5   :  { %v75_v8 = vld [vmem:[%s136_s3] ss:$0 sm:$0xff] }
   0x6   :  { %48 = vmatpush.msra.mxu0 %v23_v2 }
   0x8   :  { %49 = vmatpush.msra.mxu0 %v22_v3 }
   0x9   :  { %73 = vmatmul.msk.f32.vlgmr.msra.gmra.mxu0 %vm30_vm0, %v21_v4 }
  0x86   :  { %v51_v6 = vpop.f32.mrf.mxu0 }
  0x87   :  { %v52_v7 = vadd.f32 %v74_v5, %v51_v6 }
  0x89   :  { %v54_v9 = vmax.f32 %v52_v7, 0.0 }
  0x8b   :  { %v59_v10 = vmul.f32 %v75_v8, %v54_v9 }
  0x8d   :  { %v61_v11 = vsel %vm60_vm1, %v59_v10, 0.0 }
  0x8e   :  { %62 = vadd.xlane.f32.xlu0 %v61_v11 }
 0x101   :  { %v63_v13 = vpop.xlane.xlu0 %62 }
 0x102   :  { %v66_v14 = vadd.f32 %v65_v12, %v63_v13 }
 0x104   :  { %68 = vst.msk [vmem:[%s138_s5] sm:$0xff] %vm67_vm2, %v66_v14 }

</bundles_post_ra>
